<compile_context>
chip_gen: v6e
topology: v6e:2x2x1
jax: 0.10.0
libtpu: 0.0.40
codegen_flags: <defaults>
</compile_context>

<pallas_src>
import functools
import math

import jax
import jax.numpy as jnp
from jax.experimental import pallas as pl
from jax.experimental.pallas import tpu as pltpu


def _round_up(a, m):
    return ((a + m - 1) // m) * m


def _cdiv(a, b):
    return (a + b - 1) // b


def _ffn_kernel(x_ref, w1_ref, w2_ref, o_ref, *acc_refs, k, shift_rows,
                out_rows, scale, nf):
    # x_ref  : [rows_halo, Hp]  bf16  (row tile + (k-1)*B halo rows; rows = (t, b) flattened)
    # w1_ref : [k, Hp, tf]      bf16  (conv taps, (in_ch, filt) transposed, F-tile slice)
    # w2_ref : [tf, Hp]         bf16  (linear weight transposed, F-tile slice)
    # o_ref  : [out_rows, Hp]   output tile
    # acc_refs: () if nf == 1 else ([out_rows, Hp] f32 scratch persisting across the F axis,)

    # Time conv == sum over k shifted row-window matmuls (shift = B rows per tap).
    h = jnp.dot(x_ref[pl.ds(0, out_rows), :], w1_ref[0],
                preferred_element_type=jnp.float32)
    for j in range(1, k):                      # k is small & static -> unrolled
        h += jnp.dot(x_ref[pl.ds(j * shift_rows, out_rows), :], w1_ref[j],
                     preferred_element_type=jnp.float32)

    h = h * scale                              # * kernel_size**-0.5   (VPU)
    h = h * jax.nn.sigmoid(h)                  # SiLU in f32           (EUP)

    y = jnp.dot(h.astype(w2_ref.dtype), w2_ref[...],
                preferred_element_type=jnp.float32)

    if nf == 1:
        # Single F tile: no reduction, write straight through (no scratch traffic).
        o_ref[...] = y.astype(o_ref.dtype)
    else:
        acc_ref = acc_refs[0]
        fi = pl.program_id(1)

        @pl.when(fi == 0)
        def _init():                           # assign on first step (no zero-init pass)
            acc_ref[...] = y

        @pl.when(fi != 0)
        def _accumulate():
            acc_ref[...] += y

        @pl.when(fi == nf - 1)
        def _finalize():
            o_ref[...] = acc_ref[...].astype(o_ref.dtype)


def transformer_ffn_layer(x, w_conv, w_lin, kernel_size=1, *,
                          tm_target=512, tf_target=512,
                          prefer_single_f_tile=True,
                          compute_dtype=jnp.bfloat16):
    """Pallas implementation of TransformerFFNLayer.forward (padding='SAME').

    x      : [T, B, H]   float32
    w_conv : [F, H, k]   Conv1d weight (PyTorch layout: out_ch, in_ch, k)
    w_lin  : [H, F]      Linear weight (PyTorch layout: out_feat, in_feat)
    returns: [T, B, H]
    """
    T, B, H = x.shape
    Fdim, H_w, k = w_conv.shape
    assert H_w == H and k == kernel_size
    assert k % 2 == 1, "SAME-padding path assumes odd kernel_size"
    pad = k // 2

    # ---- lane-dense feature padding (exact: extra channels/filters are zeros) ----
    Hp = _round_up(H, 128)
    Fp = _round_up(Fdim, 128)
    tf = min(_round_up(tf_target, 128), Fp)
    # If the padded weight set fits comfortably in VMEM (double-buffered), take F in
    # one tile: constant weight block index -> pipeline fetches weights exactly once.
    itemsize_in = jnp.dtype(compute_dtype).itemsize
    w_bytes_db = 2 * (k + 1) * Hp * Fp * itemsize_in
    if prefer_single_f_tile and w_bytes_db <= 16 * 1024 * 1024:
        tf = Fp
    Fp = _round_up(Fp, tf)                    # tf must divide Fp
    nf = Fp // tf

    # ---- row (time) tiling over M = T*B ----
    tt = max(1, min(T, tm_target // max(B, 1)))
    if tt < T:
        g = 16 // math.gcd(16, B)             # smallest granule giving 16-aligned row tiles
        tt = _round_up(tt, g)
    nt = _cdiv(T, tt)
    tm = tt * B                               # output rows per tile
    rows_need = (tt + k - 1) * B              # rows per tile incl. conv halo
    rows_halo = rows_need if nt == 1 else _round_up(rows_need, 16)

    # ---- glue: SAME time padding + tile round-up, channel pad -> Hp, flatten rows ----
    Tp = nt * tt + (k - 1)
    xp = jnp.pad(x, ((pad, Tp - T - pad), (0, 0), (0, Hp - H)))     # [Tp, B, Hp]
    xp_flat = xp.reshape(Tp * B, Hp).astype(compute_dtype)

    if k == 1 or nt == 1:
        x_tiles = xp_flat                     # already exactly [nt * rows_halo, Hp]
    else:
        # Per-tile overlapping halo windows at row granularity: only the (k-1)*B halo
        # rows per tile are duplicated (NOT the k-fold im2col blow-up).
        max_row = (nt - 1) * tm + rows_halo
        if max_row > Tp * B:
            xp_flat = jnp.pad(xp_flat, ((0, max_row - Tp * B), (0, 0)))
        row_idx = jnp.arange(nt)[:, None] * tm + jnp.arange(rows_halo)[None, :]
        x_tiles = xp_flat[row_idx].reshape(nt * rows_halo, Hp)

    # ---- glue: weights as row-major matmul operands (bf16, zero-padded) ----
    w1 = jnp.transpose(w_conv, (2, 1, 0))                           # [k, H, F]
    w1 = jnp.pad(w1, ((0, 0), (0, Hp - H), (0, Fp - Fdim))).astype(compute_dtype)
    w2 = jnp.pad(w_lin.T, ((0, Fp - Fdim), (0, Hp - H))).astype(compute_dtype)

    scale = float(kernel_size) ** -0.5
    kernel = functools.partial(_ffn_kernel, k=k, shift_rows=B,
                               out_rows=tm, scale=scale, nf=nf)

    itemsize_out = jnp.dtype(x.dtype).itemsize
    cost = pl.CostEstimate(
        flops=2 * nt * tm * Hp * Fp * (k + 1),
        transcendentals=nt * tm * Fp,
        bytes_accessed=(nt * rows_halo * Hp * itemsize_in
                        + (k + 1) * Hp * Fp * itemsize_in * (nt if nf > 1 else 1)
                        + nt * tm * Hp * itemsize_out),
    )

    scratch = [] if nf == 1 else [pltpu.VMEM((tm, Hp), jnp.float32)]

    out = pl.pallas_call(
        kernel,
        out_shape=jax.ShapeDtypeStruct((nt * tm, Hp), x.dtype),
        grid_spec=pltpu.PrefetchScalarGridSpec(
            num_scalar_prefetch=0,
            grid=(nt, nf),
            in_specs=[
                pl.BlockSpec((rows_halo, Hp), lambda i, f: (i, 0)),
                pl.BlockSpec((k, Hp, tf), lambda i, f: (0, 0, f)),
                pl.BlockSpec((tf, Hp), lambda i, f: (f, 0)),
            ],
            out_specs=pl.BlockSpec((tm, Hp), lambda i, f: (i, 0)),
            scratch_shapes=scratch,
        ),
        compiler_params=pltpu.CompilerParams(
            dimension_semantics=("parallel", "arbitrary"),
            vmem_limit_bytes=48 * 1024 * 1024),
        cost_estimate=cost,
    )(x_tiles, w1, w2)

    return out[: T * B, :H].reshape(T, B, H)


def _reference(x, w_conv, w_lin, kernel_size):
    # Pure-JAX reference matching the PyTorch forward.
    k = kernel_size
    pad = k // 2
    x_nct = jnp.transpose(x, (1, 2, 0))                      # [B, H, T]
    h = jax.lax.conv_general_dilated(
        x_nct, w_conv, window_strides=(1,), padding=[(pad, pad)],
        dimension_numbers=("NCH", "OIH", "NCH"))             # [B, F, T]
    h = jnp.transpose(h, (2, 0, 1))                          # [T, B, F]
    h = h * (k ** -0.5)
    h = h * jax.nn.sigmoid(h)
    return h @ w_lin.T


if __name__ == "__main__":
    def _run_case(T, B, H, Fdim, K, tol=2e-2, **kw):
        kx, kw1, kw2 = jax.random.split(jax.random.PRNGKey(0), 3)
        x = jax.random.normal(kx, (T, B, H), dtype=jnp.float32)
        # Deterministic synthetic parameters (PyTorch weight layouts).
        w_conv = jax.random.normal(kw1, (Fdim, H, K), jnp.float32) * (1.0 / math.sqrt(H * K))
        w_lin = jax.random.normal(kw2, (H, Fdim), jnp.float32) * (1.0 / math.sqrt(Fdim))

        y = jax.block_until_ready(
            transformer_ffn_layer(x, w_conv, w_lin, kernel_size=K, **kw))
        assert y.shape == (T, B, H)

        # Reference on the same bf16-rounded operands the kernel consumes.
        rd = lambda a: a.astype(jnp.bfloat16).astype(jnp.float32)
        y_ref = _reference(rd(x), rd(w_conv), rd(w_lin), K)
        err = float(jnp.max(jnp.abs(y - y_ref)))
        assert jnp.allclose(y, y_ref, atol=tol, rtol=tol), f"max abs err {err}"

    # 1) module defaults: hidden=32, filter=64, kernel_size=1 (pointwise FFN)
    _run_case(T=8, B=2, H=32, Fdim=64, K=1)
    # 2) SAME conv with kernel_size=3, single row tile (in-kernel k-tap conv path)
    _run_case(T=8, B=2, H=32, Fdim=64, K=3)
    # 3) multi-tile path: grid over row tiles + overlapping halo windows
    _run_case(T=64, B=2, H=32, Fdim=64, K=3, tm_target=32)
    # 4) multi row-tile AND multi F-tile path (f32 VMEM accumulator across the F axis)
    _run_case(T=64, B=2, H=32, Fdim=256, K=3, tol=3e-2,
              tm_target=32, tf_target=128, prefer_single_f_tile=False)

    print("KERNEL_OK")
</pallas_src>

<mosaic_0001>
module attributes {stable_mosaic.version = 11 : i64} {
  func.func @_ffn_kernel(%arg0: i32, %arg1: i32, %arg2: memref<16x128xbf16, #tpu.memory_space<vmem>>, %arg3: memref<1x128x128xbf16, #tpu.memory_space<vmem>>, %arg4: memref<128x128xbf16, #tpu.memory_space<vmem>>, %arg5: memref<16x128xf32, #tpu.memory_space<vmem>>) attributes {dimension_semantics = [#tpu.dimension_semantics<parallel>, #tpu.dimension_semantics<arbitrary>], iteration_bounds = array<i64: 1, 1>, scalar_prefetch = 0 : i64, scratch_operands = 0 : i64, tpu.core_type = #tpu.core_type<tc>, window_params = [{transform_indices = @transform_0, window_bounds = array<i64: 16, 128>}, {transform_indices = @transform_1, window_bounds = array<i64: 1, 128, 128>}, {transform_indices = @transform_2, window_bounds = array<i64: 128, 128>}, {transform_indices = @transform_3, window_bounds = array<i64: 16, 128>}]} {
    %c0 = arith.constant 0 : index
    %c0_0 = arith.constant 0 : index
    %0 = vector.load %arg2[%c0, %c0_0] : memref<16x128xbf16, #tpu.memory_space<vmem>>, vector<16x128xbf16>
    %c0_1 = arith.constant 0 : index
    %c0_2 = arith.constant 0 : index
    %c0_3 = arith.constant 0 : index
    %1 = vector.load %arg3[%c0_1, %c0_2, %c0_3] : memref<1x128x128xbf16, #tpu.memory_space<vmem>>, vector<1x128x128xbf16>
    %2 = vector.shape_cast %1 : vector<1x128x128xbf16> to vector<128x128xbf16>
    %cst = arith.constant dense<0.000000e+00> : vector<16x128xf32>
    %3 = tpu.matmul %0, %2, %cst {dimension_numbers = #tpu.dot_dimension_numbers<[1], [0], [0], [1], [0, 0, 1, 1], [], []>} : vector<16x128xbf16>, vector<128x128xbf16>, vector<16x128xf32> -> vector<16x128xf32>
    %cst_4 = arith.constant 1.000000e+00 : f32
    %4 = vector.broadcast %cst_4 : f32 to vector<16x128xf32>
    %5 = arith.mulf %3, %4 : vector<16x128xf32>
    %6 = arith.negf %5 : vector<16x128xf32>
    %7 = math.exp %6 : vector<16x128xf32>
    %cst_5 = arith.constant 1.000000e+00 : f32
    %8 = vector.broadcast %cst_5 : f32 to vector<16x128xf32>
    %9 = arith.addf %8, %7 : vector<16x128xf32>
    %10 = arith.divf %8, %9 : vector<16x128xf32>
    %11 = arith.mulf %5, %10 : vector<16x128xf32>
    %12 = arith.truncf %11 : vector<16x128xf32> to vector<16x128xbf16>
    %c0_6 = arith.constant 0 : index
    %c0_7 = arith.constant 0 : index
    %13 = vector.load %arg4[%c0_6, %c0_7] : memref<128x128xbf16, #tpu.memory_space<vmem>>, vector<128x128xbf16>
    %cst_8 = arith.constant dense<0.000000e+00> : vector<16x128xf32>
    %14 = tpu.matmul %12, %13, %cst_8 {dimension_numbers = #tpu.dot_dimension_numbers<[1], [0], [0], [1], [0, 0, 1, 1], [], []>} : vector<16x128xbf16>, vector<128x128xbf16>, vector<16x128xf32> -> vector<16x128xf32>
    %c0_9 = arith.constant 0 : index
    %c0_10 = arith.constant 0 : index
    %15 = vector.load %arg5[%c0_9, %c0_10] : memref<16x128xf32, #tpu.memory_space<vmem>>, vector<16x128xf32>
    tpu.vector_store %arg5[%c0_9, %c0_10], %14 {strides = array<i32>} : memref<16x128xf32, #tpu.memory_space<vmem>>, vector<16x128xf32>,
    return
  }
  func.func @transform_0(%arg0: i32, %arg1: i32) -> (i32, i32) {
    %c0_i32 = arith.constant 0 : i32
    %c0_i32_0 = arith.constant 0 : i32
    return %arg0, %c0_i32 : i32, i32
  }
  func.func @transform_1(%arg0: i32, %arg1: i32) -> (i32, i32, i32) {
    %c0_i32 = arith.constant 0 : i32
    %c0_i32_0 = arith.constant 0 : i32
    %c0_i32_1 = arith.constant 0 : i32
    return %c0_i32, %c0_i32_0, %arg1 : i32, i32, i32
  }
  func.func @transform_2(%arg0: i32, %arg1: i32) -> (i32, i32) {
    %c0_i32 = arith.constant 0 : i32
    %c0_i32_0 = arith.constant 0 : i32
    return %arg1, %c0_i32 : i32, i32
  }
  func.func @transform_3(%arg0: i32, %arg1: i32) -> (i32, i32) {
    %c0_i32 = arith.constant 0 : i32
    %c0_i32_0 = arith.constant 0 : i32
    return %arg0, %c0_i32 : i32, i32
  }
}

</mosaic_0001>

<bundles_post_ra>
// kernel: tpu_custom_call.1
= control target key start
LH: loop header
LB: loop body
LE: loop exit
PB: predicated region body
PF: predicated region fallthrough
CT: control target
= control target key end

     0   :  { %8 = vsyncpa [#allocation3], 0  ;;  %s550_s0 = inlined_call_operand.hbm [shape: bf16[16,128], index: 0, kind: input, shape index: {}]   ;;  %s551_s1 = inlined_call_operand.hbm [shape: bf16[1,128,128], index: 1, kind: input, shape index: {}]   ;;  %s552_s2 = inlined_call_operand.hbm [shape: bf16[128,128], index: 2, kind: input, shape index: {}]   ;;  %s553_s3 = inlined_call_operand.hbm [shape: f32[16,128], index: 3, kind: output, shape index: {}]  }
   0x1   :  { %9 = vsyncpa [#allocation6], 0 }
   0x2   :  { %10 = vsyncpa [#allocation4], 0  ;;  %s508_s12 = smov [#allocation5]   ;;  %s509_s14 = smov [#allocation2]  }
   0x3   :  { %s28_s13 = sshll.u32 %s508_s12, 4  ;;  %s16_s15 = sshll.u32 %s509_s14, 4  ;;  %s29_s13 = int_to_ptr.vmem [resolvable:$true] %s28_s13  ;;  %s17_s15 = int_to_ptr.vmem [resolvable:$true] %s16_s15 }
   0x4   :  { %s430_s16 = scalar_lea.vmem %s29_s13, 1024  ;;  %p435_p1 = scmp.lt.s32.totalorder %s29_s13, %s29_s13 }
   0x5   :  { %p431_p0 = scmp.ne.s32.totalorder %s29_s13, %s430_s16  ;;  %p436_p2 = scmp.lt.s32.totalorder %s430_s16, %s430_s16 }
   0x7   :  { %p437_p3 = por %p436_p2, %p435_p1 }
   0x9   :  { %p438_p4 = pnand %p437_p3, %p431_p0 }
   0xb   :  { %441 = shalt.err (!%p438_p4)
}
   0xc   :  { %s510_s17 = smov 64   ;;  %s511_s18 = smov 4  }
   0xd   :  { %34 = dma.hbm_to_vmem [thread:$0]  %s551_s1, 1024, %s29_s13, [#allocation6], %s510_s17, %s510_s17, %s511_s18  }
   0xe   :  { %s450_s21 = scalar_lea.vmem %s17_s15, 128  ;;  %p455_p6 = scmp.lt.s32.totalorder %s17_s15, %s17_s15 }
   0xf   :  { %p451_p5 = scmp.ne.s32.totalorder %s17_s15, %s450_s21  ;;  %p456_p7 = scmp.lt.s32.totalorder %s450_s21, %s450_s21 }
  0x11   :  { %p457_p8 = por %p456_p7, %p455_p6 }
  0x13   :  { %p458_p9 = pnand %p457_p8, %p451_p5 }
  0x15   :  { %461 = shalt.err (!%p458_p9)
}
  0x16   :  { %22 = dma.hbm_to_vmem [thread:$0]  %s550_s0, 128, %s17_s15, [#allocation3], %s510_s17, %s510_s17, %s511_s18  }
  0x17   :  { %s512_s24 = smov [#allocation7]  }
  0x18   :  { %s40_s25 = sshll.u32 %s512_s24, 4  ;;  %s41_s25 = int_to_ptr.vmem [resolvable:$true] %s40_s25 }
  0x19   :  { %s470_s26 = scalar_lea.vmem %s41_s25, 1024  ;;  %p475_p11 = scmp.lt.s32.totalorder %s41_s25, %s41_s25 }
  0x1a   :  { %p471_p10 = scmp.ne.s32.totalorder %s41_s25, %s470_s26  ;;  %p476_p12 = scmp.lt.s32.totalorder %s470_s26, %s470_s26 }
  0x1c   :  { %p477_p13 = por %p476_p12, %p475_p11 }
  0x1e   :  { %p478_p0 = pnand %p477_p13, %p471_p10 }
  0x20   :  { %481 = shalt.err (!%p478_p0)
}
  0x21   :  { %46 = dma.hbm_to_vmem [thread:$0]  %s552_s2, 1024, %s41_s25, [#allocation6], %s510_s17, %s510_s17, %s511_s18  }
  0x22   :  { %502 = dma.done.wait [#allocation3], 128  }
  0x23   :  { %503 = vsyncadd [#allocation3], 4294967168 }
  0x24   :  { %504 = dma.done.wait [#allocation6], 2048  }
  0x25   :  { %505 = vsyncadd [#allocation6], 4294965248  ;;  %v513_v0 = vmov 0.0   ;;  %vm514_vm0 = vmmov 0   ;;  %v397_v1 = vld [vmem:[#allocation5 + $0x38] sm:$0xff]   ;;  %v398_v2 = vld [vmem:[#allocation5 + $0x30] sm:$0xff]  }
  0x26   :  { %347 = vmatprep.subr.bf16.mxu0 %v513_v0  ;;  %363 = vmatprep.mubr.msk.bf16.mxu0 %vm514_vm0, %v513_v0  ;;  %v399_v3 = vld [vmem:[#allocation5 + $0x28] sm:$0xff]   ;;  %v400_v4 = vld [vmem:[#allocation5 + $0x20] sm:$0xff]   ;;  %v401_v5 = vld [vmem:[#allocation5 + $0x18] sm:$0xff]   ;;  %s515_s0 = smov [#allocation8]  }
  0x27   :  { %367 = vmatprep.subr.bf16.mxu1 %v513_v0  ;;  %383 = vmatprep.mubr.msk.bf16.mxu1 %vm514_vm0, %v513_v0  ;;  %v402_v6 = vld [vmem:[#allocation5 + $0x10] sm:$0xff]   ;;  %v403_v7 = vld [vmem:[#allocation5 + $0x8] sm:$0xff]   ;;  %v404_v8 = vld [vmem:[#allocation5] sm:$0xff]   ;;  %s297_s2 = sshll.u32 %s515_s0, 4  ;;  %s298_s2 = int_to_ptr.vmem [resolvable:$true] %s297_s2 }
  0x28   :  { %348 = vmatpush3.bf16.msra.mxu0 %v397_v1  ;;  %v405_v9 = vld [vmem:[#allocation2] sm:$0xff]   ;;  %v407_v11 = vld [vmem:[#allocation7 + $0x30] sm:$0xff]   ;;  %v408_v12 = vld [vmem:[#allocation7 + $0x28] sm:$0xff]   ;;  %s482_s28 = scalar_lea.vmem %s298_s2, 256  ;;  %p487_p2 = scmp.lt.s32.totalorder %s298_s2, %s298_s2 }
  0x29   :  { %349 = vmatprep.subr.bf16.mxu0 %v513_v0  ;;  %v406_v10 = vld [vmem:[#allocation7 + $0x38] sm:$0xff]   ;;  %v409_v13 = vld [vmem:[#allocation7 + $0x20] sm:$0xff]   ;;  %v411_v15 = vld [vmem:[#allocation7 + $0x10] sm:$0xff]   ;;  %p483_p1 = scmp.ne.s32.totalorder %s298_s2, %s482_s28  ;;  %p488_p3 = scmp.lt.s32.totalorder %s482_s28, %s482_s28 }
  0x2a   :  { %368 = vmatpush3.bf16.msra.mxu1 %v406_v10  ;;  %v410_v14 = vld [vmem:[#allocation7 + $0x18] sm:$0xff]   ;;  %v412_v16 = vld [vmem:[#allocation7 + $0x8] sm:$0xff]   ;;  %v413_v17 = vld [vmem:[#allocation7] sm:$0xff]  }
  0x2b   :  { %369 = vmatprep.subr.bf16.mxu1 %v513_v0  ;;  %p489_p4 = por %p488_p3, %p487_p2 }
  0x2c   :  { %350 = vmatpush3.bf16.msra.mxu0 %v398_v2 }
  0x2d   :  { %351 = vmatprep.subr.bf16.mxu0 %v513_v0  ;;  %p490_p5 = pnand %p489_p4, %p483_p1 }
  0x2e   :  { %370 = vmatpush3.bf16.msra.mxu1 %v407_v11 }
  0x2f   :  { %371 = vmatprep.subr.bf16.mxu1 %v513_v0 }
  0x30   :  { %352 = vmatpush3.bf16.msra.mxu0 %v399_v3 }
  0x31   :  { %353 = vmatprep.subr.bf16.mxu0 %v513_v0 }
  0x32   :  { %372 = vmatpush3.bf16.msra.mxu1 %v408_v12 }
  0x33   :  { %373 = vmatprep.subr.bf16.mxu1 %v513_v0 }
  0x34   :  { %354 = vmatpush3.bf16.msra.mxu0 %v400_v4 }
  0x35   :  { %355 = vmatprep.subr.bf16.mxu0 %v513_v0 }
  0x36   :  { %374 = vmatpush3.bf16.msra.mxu1 %v409_v13 }
  0x37   :  { %375 = vmatprep.subr.bf16.mxu1 %v513_v0 }
  0x38   :  { %356 = vmatpush3.bf16.msra.mxu0 %v401_v5 }
  0x39   :  { %357 = vmatprep.subr.bf16.mxu0 %v513_v0 }
  0x3a   :  { %376 = vmatpush3.bf16.msra.mxu1 %v410_v14 }
  0x3b   :  { %377 = vmatprep.subr.bf16.mxu1 %v513_v0 }
  0x3c   :  { %358 = vmatpush3.bf16.msra.mxu0 %v402_v6 }
  0x3d   :  { %359 = vmatprep.subr.bf16.mxu0 %v513_v0 }
  0x3e   :  { %378 = vmatpush3.bf16.msra.mxu1 %v411_v15 }
  0x3f   :  { %379 = vmatprep.subr.bf16.mxu1 %v513_v0 }
  0x40   :  { %360 = vmatpush3.bf16.msra.mxu0 %v403_v7 }
  0x41   :  { %361 = vmatprep.subr.bf16.mxu0 %v513_v0 }
  0x42   :  { %380 = vmatpush3.bf16.msra.mxu1 %v412_v16 }
  0x43   :  { %381 = vmatprep.subr.bf16.mxu1 %v513_v0 }
  0x44   :  { %362 = vmatpush3.bf16.msra.mxu0 %v404_v8 }
  0x46   :  { %382 = vmatpush3.bf16.msra.mxu1 %v413_v17 }
  0x47   :  { %364 = vmatmul.mubr.bf16.vlgmr.msra.gmra.mxu0 %v405_v9 }
 0x107   :  { %v163_v18 = vpop.f32.mrf.mxu0 }
 0x108   :  { %v319_v19 = vmul.f32 -1.442695, %v163_v18 }
 0x109   :  { %v365_v20 = vpop.f32.mrf.mxu0 }
 0x10a   :  { %414 = vpow2.f32 %v319_v19 }
 0x10b   :  { %v166_v21 = vpop.f32.mrf.mxu0 }
 0x10c   :  { %v320_v22 = vmul.f32 -1.442695, %v166_v21 }
 0x10d   :  { %v366_v23 = vpop.f32.mrf.mxu0 }
 0x10e   :  { %416 = vpow2.f32 %v320_v22 }
 0x117   :  { %v415_v24 = vpop.eup %414 }
 0x118   :  { %v176_v25 = vadd.f32 1.0, %v415_v24 }
 0x11a   :  { %418 = vrcp.f32 %v176_v25 }
 0x11b   :  { %v417_v26 = vpop.eup %416 }
 0x11c   :  { %v177_v27 = vadd.f32 1.0, %v417_v26 }
 0x11e   :  { %420 = vrcp.f32 %v177_v27 }
 0x127   :  { %v419_v28 = vpop.eup %418 }
 0x128   :  { %v182_v30 = vmul.f32 %v419_v28, %v163_v18 }
 0x12b   :  { %v421_v29 = vpop.eup %420 }
 0x12c   :  { %v183_v31 = vmul.f32 %v421_v29, %v166_v21 }
 0x12e   :  { %v184_v32 = vpack.c.bf16 %v183_v31, %v182_v30 }
 0x130   :  { %384 = vmatmul.mubr.bf16.vlgmr.msra.gmra.mxu1 %v184_v32 }
 0x1f0   :  { %v283_v33 = vpop.f32.mrf.mxu1 }
 0x1f1   :  { %290 = vst [vmem:[#allocation8] sm:$0xff] %v283_v33 }
 0x1f2   :  { %v385_v34 = vpop.f32.mrf.mxu1 }
 0x1f4   :  { %v286_v35 = vpop.f32.mrf.mxu1 }
 0x1f5   :  { %291 = vst [vmem:[#allocation8 + $0x8] sm:$0xff] %v286_v35 }
 0x1f6   :  { %v386_v36 = vpop.f32.mrf.mxu1 }
 0x1f7   :  { %493 = shalt.err (!%p490_p5)
}
 0x1f8   :  { %s516_s29 = smov 128   ;;  %s517_s30 = smov 8  }
 0x1f9   :  { %303 = dma.vmem_to_hbm [thread:$0]  %s298_s2, 256, %s553_s3, [#allocation4], %s516_s29, %s516_s29, %s517_s30  }
 0x1fa   :  { %506 = dma.done.wait [#allocation4], 256  }
 0x1fb   :  { %507 = vsyncadd [#allocation4], 4294967040 }
 0x1fc   :  { %307 = vsyncpa [#allocation3], 1 }
 0x1fd   :  { %308 = vsyncpa [#allocation6], 1 }
 0x1fe   :  { %309 = vsyncpa [#allocation4], 1 }

</bundles_post_ra>
